<compile_context>
chip_gen: v7x
topology: tpu7x:2x2x1
jax: 0.10.0
libtpu: 0.0.40
codegen_flags: <defaults>
</compile_context>

<pallas_src>
import functools

import jax
import jax.numpy as jnp
from jax.experimental import pallas as pl
from jax.experimental.pallas import tpu as pltpu


def _ca_kernel(x_ref, w1_ref, w2_ref, o_ref, sum_acc, max_acc, stats_ref, *,
               hw_total, hw_tile, bb):
    # x_ref block: (bb, C, hw_tile)   [C on sublanes, HW on lanes]
    # w1_ref: (Ch, C); w2_ref: (C, Ch); o_ref block: (bb, C, 1)
    # sum_acc / max_acc: (bb, C, 1) f32 scratch (persist across hw tiles)
    # stats_ref: (C, 2*bb) f32 scratch used once per batch block at finalize
    t = pl.program_id(1)
    nt = pl.num_programs(1)

    @pl.when(t == 0)
    def _init():
        sum_acc[...] = jnp.zeros_like(sum_acc)
        max_acc[...] = jnp.full_like(max_acc, -jnp.inf)

    x = x_ref[...]                                      # (bb, C, hw_tile)

    def _accumulate(x_for_sum, x_for_max):
        # Lane-axis reductions (XLU); sum accumulates in f32.
        sum_acc[...] += jnp.sum(x_for_sum, axis=-1, keepdims=True,
                                dtype=jnp.float32)
        max_acc[...] = jnp.maximum(
            max_acc[...],
            jnp.max(x_for_max, axis=-1, keepdims=True).astype(jnp.float32))

    if hw_total % hw_tile != 0:
        # Ragged spatial extent: keep the mask off the steady-state path and
        # only pay for it on the final (partial) tile.
        @pl.when(t < nt - 1)
        def _steady():
            _accumulate(x, x)

        @pl.when(t == nt - 1)
        def _ragged_last():
            pos = t * hw_tile + jax.lax.broadcasted_iota(jnp.int32, x.shape, 2)
            valid = pos < hw_total
            _accumulate(jnp.where(valid, x, jnp.zeros_like(x)),
                        jnp.where(valid, x, jnp.full_like(x, -jnp.inf)))
    else:
        _accumulate(x, x)

    @pl.when(t == nt - 1)
    def _finalize():
        inv_hw = jnp.float32(1.0 / hw_total)
        # Pack every image's avg / max pooled vectors as columns of a single
        # (C, 2*bb) stats matrix (avg columns first, then max columns) so the
        # shared MLP runs as two batched MXU matmuls per batch block.
        for i in range(bb):                              # static unroll
            stats_ref[:, i:i + 1] = sum_acc[i] * inv_hw        # (C, 1)
            stats_ref[:, bb + i:bb + i + 1] = max_acc[i]       # (C, 1)

        w1 = w1_ref[...].astype(jnp.float32)             # (Ch, C)
        w2 = w2_ref[...].astype(jnp.float32)             # (C, Ch)
        h = jnp.maximum(
            jnp.dot(w1, stats_ref[...], preferred_element_type=jnp.float32),
            0.0)                                         # (Ch, 2*bb)
        y = jnp.dot(w2, h, preferred_element_type=jnp.float32)   # (C, 2*bb)

        for i in range(bb):                              # static unroll
            yi = y[:, i:i + 1] + y[:, bb + i:bb + i + 1]   # avg path + max path
            o_ref[i] = jax.nn.sigmoid(yi).astype(o_ref.dtype)


_MAX_BB = 128          # cap on images per block (finalize loop is unrolled)


def _vmem_limit_bytes():
    """Generation-aware scoped-VMEM request (v5e/v6e: 128 MiB physical,
    v7x: 64 MiB).  Falls back to a v7x-safe value if the query fails."""
    cap = None
    try:
        cap = getattr(pltpu.get_tpu_info(), "vmem_capacity_bytes", None)
    except Exception:
        cap = None
    if not cap:
        cap = 64 * 1024 * 1024
    return int(max(min(cap * 3 // 4, 100 * 1024 * 1024), 16 * 1024 * 1024))


def _pick_tiles(B, C, HW, x_itemsize, w_bytes, vmem_limit, bb, hw_tile):
    # Per-buffer x budget: x is double-buffered by the pipeline; reserve room
    # for the (double-buffered) weights, output blocks, accumulators, the
    # stats scratch and compiler temporaries.
    reserve = 2 * w_bytes + 4 * 1024 * 1024
    x_budget = max((vmem_limit - reserve) // 2, 256 * 1024)

    per_image = C * HW * x_itemsize
    if bb is None:
        if per_image <= x_budget:
            bb = int(min(B, _MAX_BB, max(x_budget // per_image, 1)))
            # f32 accumulators are lane-padded to 128; keep them <= ~4 MiB.
            acc_row_bytes = 2 * (-(-C // 8) * 8) * 128 * 4
            bb = max(1, min(bb, (4 * 1024 * 1024) // acc_row_bytes))
        else:
            bb = 1
    if hw_tile is None:
        if per_image <= x_budget:
            hw_tile = HW           # whole spatial extent: one contiguous DMA
        else:
            lanes = max((x_budget // (C * x_itemsize)) // 128 * 128, 128)
            hw_tile = int(min(HW, lanes))
    return int(bb), int(hw_tile)


def channel_attention(x_nchw, w1, w2, *, bb=None, hw_tile=None):
    """x_nchw: (B, C, H, W); w1: (C//ratio, C); w2: (C, C//ratio).
    Returns (B, C, 1, 1), matching ChannelAttention.forward."""
    B, C, H, W = x_nchw.shape
    HW = H * W
    Ch = w1.shape[0]
    assert w1.shape == (Ch, C) and w2.shape == (C, Ch)

    # Native NCHW layout: a contiguous reshape only -- no XLA transpose pass.
    x_flat = x_nchw.reshape(B, C, HW)

    vmem_limit = _vmem_limit_bytes()
    w_bytes = (w1.size + w2.size) * jnp.dtype(w1.dtype).itemsize
    bb, hw_tile = _pick_tiles(B, C, HW, jnp.dtype(x_nchw.dtype).itemsize,
                              w_bytes, vmem_limit, bb, hw_tile)

    num_b = pl.cdiv(B, bb)
    num_t = pl.cdiv(HW, hw_tile)

    kernel = functools.partial(_ca_kernel, hw_total=HW, hw_tile=hw_tile, bb=bb)

    # TODO(synk): on v7x with a single batch block, split the HW range across
    # the two TensorCores on a leading parallel axis and combine the partial
    # (sum, max) accumulators so both cores stay busy.
    out = pl.pallas_call(
        kernel,
        out_shape=jax.ShapeDtypeStruct((B, C, 1), x_nchw.dtype),
        grid_spec=pltpu.PrefetchScalarGridSpec(
            num_scalar_prefetch=0,
            grid=(num_b, num_t),
            in_specs=[
                pl.BlockSpec((bb, C, hw_tile), lambda b, t: (b, 0, t)),
                pl.BlockSpec((Ch, C), lambda b, t: (0, 0)),
                pl.BlockSpec((C, Ch), lambda b, t: (0, 0)),
            ],
            out_specs=pl.BlockSpec((bb, C, 1), lambda b, t: (b, 0, 0)),
            scratch_shapes=[
                pltpu.VMEM((bb, C, 1), jnp.float32),    # running sum
                pltpu.VMEM((bb, C, 1), jnp.float32),    # running max
                pltpu.VMEM((C, 2 * bb), jnp.float32),   # packed pooled stats
            ],
        ),
        compiler_params=pltpu.CompilerParams(
            dimension_semantics=("parallel", "arbitrary"),
            vmem_limit_bytes=vmem_limit),
    )(x_flat, w1, w2)

    return out.reshape(B, C, 1, 1)


def channel_attention_ref(x_nchw, w1, w2):
    # Pure-JAX reference mirroring the PyTorch forward.
    avg = jnp.mean(x_nchw, axis=(2, 3))                   # (B, C)
    mx = jnp.max(x_nchw, axis=(2, 3))                     # (B, C)

    def mlp(v):
        return jnp.maximum(v @ w1.T, 0.0) @ w2.T          # fc2(relu(fc1(v)))

    out = jax.nn.sigmoid(mlp(avg) + mlp(mx))              # (B, C)
    return out[:, :, None, None]


if __name__ == "__main__":
    # Shapes consistent with the module: in_planes divisible by ratio=12.
    ratio = 12
    key = jax.random.PRNGKey(0)
    kx, k1, k2, kx2, kx3 = jax.random.split(key, 5)

    B, C, H, W = 2, 24, 16, 16
    Ch = C // ratio
    x = jax.random.normal(kx, (B, C, H, W), dtype=jnp.float32)
    # Conv2d(C, Ch, 1, bias=False).weight squeezed to (Ch, C) / (C, Ch).
    w1 = jax.random.normal(k1, (Ch, C), dtype=jnp.float32) * (1.0 / jnp.sqrt(C))
    w2 = jax.random.normal(k2, (C, Ch), dtype=jnp.float32) * (1.0 / jnp.sqrt(Ch))

    # Case 1: batched single-block path (whole batch + whole HW in one step).
    out = jax.block_until_ready(channel_attention(x, w1, w2))
    ref = channel_attention_ref(x, w1, w2)
    assert out.shape == (B, C, 1, 1)
    assert jnp.allclose(out, ref, atol=1e-5, rtol=1e-5)

    # Case 2: HW-tiled path with a ragged last tile (HW=400, tile=128).
    x2 = jax.random.normal(kx2, (B, C, 20, 20), dtype=jnp.float32)
    out2 = jax.block_until_ready(channel_attention(x2, w1, w2, bb=1, hw_tile=128))
    ref2 = channel_attention_ref(x2, w1, w2)
    assert jnp.allclose(out2, ref2, atol=1e-5, rtol=1e-5)

    # Case 3: batch-tiled path with a ragged last batch block (B=5, bb=2).
    x3 = jax.random.normal(kx3, (5, C, H, W), dtype=jnp.float32)
    out3 = jax.block_until_ready(channel_attention(x3, w1, w2, bb=2))
    ref3 = channel_attention_ref(x3, w1, w2)
    assert out3.shape == (5, C, 1, 1)
    assert jnp.allclose(out3, ref3, atol=1e-5, rtol=1e-5)

    print("KERNEL_OK")
</pallas_src>

<mosaic_0001>
module attributes {stable_mosaic.version = 11 : i64} {
  func.func @_ca_kernel(%arg0: i32, %arg1: i32, %arg2: memref<2x24x256xf32, #tpu.memory_space<vmem>>, %arg3: memref<2x24xf32, #tpu.memory_space<vmem>>, %arg4: memref<24x2xf32, #tpu.memory_space<vmem>>, %arg5: memref<2x24x1xf32, #tpu.memory_space<vmem>>, %arg6: memref<2x24x1xf32, #tpu.memory_space<vmem>>, %arg7: memref<2x24x1xf32, #tpu.memory_space<vmem>>, %arg8: memref<24x4xf32, #tpu.memory_space<vmem>>) attributes {dimension_semantics = [#tpu.dimension_semantics<parallel>, #tpu.dimension_semantics<arbitrary>], iteration_bounds = array<i64: 1, 1>, scalar_prefetch = 0 : i64, scratch_operands = 3 : i64, tpu.core_type = #tpu.core_type<tc>, window_params = [{transform_indices = @transform_0, window_bounds = array<i64: 2, 24, 256>}, {pipeline_mode = #tpu.pipeline_mode<synchronous>, transform_indices = @transform_1, window_bounds = array<i64: 2, 24>}, {pipeline_mode = #tpu.pipeline_mode<synchronous>, transform_indices = @transform_2, window_bounds = array<i64: 24, 2>}, {transform_indices = @transform_3, window_bounds = array<i64: 2, 24, 1>}]} {
    %c0_i32 = arith.constant 0 : i32
    %0 = arith.cmpi eq, %arg1, %c0_i32 : i32
    %1 = arith.extui %0 : i1 to i32
    %c0_i32_0 = arith.constant 0 : i32
    %2 = arith.cmpi ne, %1, %c0_i32_0 : i32
    scf.if %2 {
      %cst_18 = arith.constant 0.000000e+00 : f32
      %17 = vector.broadcast %cst_18 : f32 to vector<2x24x1xf32>
      %c0_19 = arith.constant 0 : index
      %c0_20 = arith.constant 0 : index
      %c0_21 = arith.constant 0 : index
      %18 = vector.load %arg6[%c0_19, %c0_20, %c0_21] : memref<2x24x1xf32, #tpu.memory_space<vmem>>, vector<2x24x1xf32>
      tpu.vector_store %arg6[%c0_19, %c0_20, %c0_21], %17 {strides = array<i32>} : memref<2x24x1xf32, #tpu.memory_space<vmem>>, vector<2x24x1xf32>,
      %cst_22 = arith.constant 0xFF800000 : f32
      %19 = vector.broadcast %cst_22 : f32 to vector<2x24x1xf32>
      %c0_23 = arith.constant 0 : index
      %c0_24 = arith.constant 0 : index
      %c0_25 = arith.constant 0 : index
      %20 = vector.load %arg7[%c0_23, %c0_24, %c0_25] : memref<2x24x1xf32, #tpu.memory_space<vmem>>, vector<2x24x1xf32>
      tpu.vector_store %arg7[%c0_23, %c0_24, %c0_25], %19 {strides = array<i32>} : memref<2x24x1xf32, #tpu.memory_space<vmem>>, vector<2x24x1xf32>,
    } else {
    }
    %c0 = arith.constant 0 : index
    %c0_1 = arith.constant 0 : index
    %c0_2 = arith.constant 0 : index
    %3 = vector.load %arg2[%c0, %c0_1, %c0_2] : memref<2x24x256xf32, #tpu.memory_space<vmem>>, vector<2x24x256xf32>
    %c0_3 = arith.constant 0 : index
    %c0_4 = arith.constant 0 : index
    %c0_5 = arith.constant 0 : index
    %4 = vector.load %arg6[%c0_3, %c0_4, %c0_5] : memref<2x24x1xf32, #tpu.memory_space<vmem>>, vector<2x24x1xf32>
    %cst = arith.constant dense<0.000000e+00> : vector<2x24xf32>
    %5 = vector.multi_reduction <add>, %3, %cst [2] : vector<2x24x256xf32> to vector<2x24xf32>
    %6 = vector.shape_cast %5 : vector<2x24xf32> to vector<2x24x1xf32>
    %7 = arith.addf %4, %6 : vector<2x24x1xf32>
    %c0_6 = arith.constant 0 : index
    %c0_7 = arith.constant 0 : index
    %c0_8 = arith.constant 0 : index
    %8 = vector.load %arg6[%c0_6, %c0_7, %c0_8] : memref<2x24x1xf32, #tpu.memory_space<vmem>>, vector<2x24x1xf32>
    tpu.vector_store %arg6[%c0_6, %c0_7, %c0_8], %7 {strides = array<i32>} : memref<2x24x1xf32, #tpu.memory_space<vmem>>, vector<2x24x1xf32>,
    %c0_9 = arith.constant 0 : index
    %c0_10 = arith.constant 0 : index
    %c0_11 = arith.constant 0 : index
    %9 = vector.load %arg7[%c0_9, %c0_10, %c0_11] : memref<2x24x1xf32, #tpu.memory_space<vmem>>, vector<2x24x1xf32>
    %cst_12 = arith.constant dense<0xFF800000> : vector<2x24xf32>
    %10 = vector.multi_reduction <maximumf>, %3, %cst_12 [2] : vector<2x24x256xf32> to vector<2x24xf32>
    %11 = vector.shape_cast %10 : vector<2x24xf32> to vector<2x24x1xf32>
    %12 = arith.maximumf %9, %11 : vector<2x24x1xf32>
    %c0_13 = arith.constant 0 : index
    %c0_14 = arith.constant 0 : index
    %c0_15 = arith.constant 0 : index
    %13 = vector.load %arg7[%c0_13, %c0_14, %c0_15] : memref<2x24x1xf32, #tpu.memory_space<vmem>>, vector<2x24x1xf32>
    tpu.vector_store %arg7[%c0_13, %c0_14, %c0_15], %12 {strides = array<i32>} : memref<2x24x1xf32, #tpu.memory_space<vmem>>, vector<2x24x1xf32>,
    %c0_i32_16 = arith.constant 0 : i32
    %14 = arith.cmpi eq, %arg1, %c0_i32_16 : i32
    %15 = arith.extui %14 : i1 to i32
    %c0_i32_17 = arith.constant 0 : i32
    %16 = arith.cmpi ne, %15, %c0_i32_17 : i32
    scf.if %16 {
      %c0_18 = arith.constant 0 : index
      %c0_19 = arith.constant 0 : index
      %c0_20 = arith.constant 0 : index
      %17 = vector.load %arg6[%c0_18, %c0_19, %c0_20] : memref<2x24x1xf32, #tpu.memory_space<vmem>>, vector<1x24x1xf32>
      %18 = vector.shape_cast %17 : vector<1x24x1xf32> to vector<24x1xf32>
      %cst_21 = arith.constant 3.906250e-03 : f32
      %19 = vector.broadcast %cst_21 : f32 to vector<24x1xf32>
      %20 = arith.mulf %18, %19 : vector<24x1xf32>
      %c0_22 = arith.constant 0 : index
      %c0_23 = arith.constant 0 : index
      %21 = vector.load %arg8[%c0_22, %c0_23] : memref<24x4xf32, #tpu.memory_space<vmem>>, vector<24x1xf32>
      tpu.vector_store %arg8[%c0_22, %c0_23], %20 {strides = array<i32>} : memref<24x4xf32, #tpu.memory_space<vmem>>, vector<24x1xf32>,
      %c0_24 = arith.constant 0 : index
      %c0_25 = arith.constant 0 : index
      %c0_26 = arith.constant 0 : index
      %22 = vector.load %arg7[%c0_24, %c0_25, %c0_26] : memref<2x24x1xf32, #tpu.memory_space<vmem>>, vector<1x24x1xf32>
      %23 = vector.shape_cast %22 : vector<1x24x1xf32> to vector<24x1xf32>
      %c0_27 = arith.constant 0 : index
      %c2 = arith.constant 2 : index
      %24 = vector.load %arg8[%c0_27, %c2] : memref<24x4xf32, #tpu.memory_space<vmem>>, vector<24x1xf32>
      tpu.vector_store %arg8[%c0_27, %c2], %23 {strides = array<i32>} : memref<24x4xf32, #tpu.memory_space<vmem>>, vector<24x1xf32>,
      %c1 = arith.constant 1 : index
      %c0_28 = arith.constant 0 : index
      %c0_29 = arith.constant 0 : index
      %25 = vector.load %arg6[%c1, %c0_28, %c0_29] : memref<2x24x1xf32, #tpu.memory_space<vmem>>, vector<1x24x1xf32>
      %26 = vector.shape_cast %25 : vector<1x24x1xf32> to vector<24x1xf32>
      %cst_30 = arith.constant 3.906250e-03 : f32
      %27 = vector.broadcast %cst_30 : f32 to vector<24x1xf32>
      %28 = arith.mulf %26, %27 : vector<24x1xf32>
      %c0_31 = arith.constant 0 : index
      %c1_32 = arith.constant 1 : index
      %29 = vector.load %arg8[%c0_31, %c1_32] : memref<24x4xf32, #tpu.memory_space<vmem>>, vector<24x1xf32>
      tpu.vector_store %arg8[%c0_31, %c1_32], %28 {strides = array<i32>} : memref<24x4xf32, #tpu.memory_space<vmem>>, vector<24x1xf32>,
      %c1_33 = arith.constant 1 : index
      %c0_34 = arith.constant 0 : index
      %c0_35 = arith.constant 0 : index
      %30 = vector.load %arg7[%c1_33, %c0_34, %c0_35] : memref<2x24x1xf32, #tpu.memory_space<vmem>>, vector<1x24x1xf32>
      %31 = vector.shape_cast %30 : vector<1x24x1xf32> to vector<24x1xf32>
      %c0_36 = arith.constant 0 : index
      %c3 = arith.constant 3 : index
      %32 = vector.load %arg8[%c0_36, %c3] : memref<24x4xf32, #tpu.memory_space<vmem>>, vector<24x1xf32>
      tpu.vector_store %arg8[%c0_36, %c3], %31 {strides = array<i32>} : memref<24x4xf32, #tpu.memory_space<vmem>>, vector<24x1xf32>,
      %c0_37 = arith.constant 0 : index
      %c0_38 = arith.constant 0 : index
      %33 = vector.load %arg3[%c0_37, %c0_38] : memref<2x24xf32, #tpu.memory_space<vmem>>, vector<2x24xf32>
      %c0_39 = arith.constant 0 : index
      %c0_40 = arith.constant 0 : index
      %34 = vector.load %arg4[%c0_39, %c0_40] : memref<24x2xf32, #tpu.memory_space<vmem>>, vector<24x2xf32>
      %c0_41 = arith.constant 0 : index
      %c0_42 = arith.constant 0 : index
      %35 = vector.load %arg8[%c0_41, %c0_42] : memref<24x4xf32, #tpu.memory_space<vmem>>, vector<24x4xf32>
      %cst_43 = arith.constant dense<0.000000e+00> : vector<2x4xf32>
      %36 = tpu.matmul %33, %35, %cst_43 {dimension_numbers = #tpu.dot_dimension_numbers<[1], [0], [0], [1], [0, 0, 1, 1], [], []>} : vector<2x24xf32>, vector<24x4xf32>, vector<2x4xf32> -> vector<2x4xf32>
      %cst_44 = arith.constant 0.000000e+00 : f32
      %37 = vector.broadcast %cst_44 : f32 to vector<2x4xf32>
      %38 = arith.maximumf %36, %37 : vector<2x4xf32>
      %cst_45 = arith.constant dense<0.000000e+00> : vector<24x4xf32>
      %39 = tpu.matmul %34, %38, %cst_45 {dimension_numbers = #tpu.dot_dimension_numbers<[1], [0], [0], [1], [0, 0, 1, 1], [], []>} : vector<24x2xf32>, vector<2x4xf32>, vector<24x4xf32> -> vector<24x4xf32>
      %40 = vector.extract_strided_slice %39 {offsets = [0, 0], sizes = [24, 1], strides = [1, 1]} : vector<24x4xf32> to vector<24x1xf32>
      %41 = vector.extract_strided_slice %39 {offsets = [0, 2], sizes = [24, 1], strides = [1, 1]} : vector<24x4xf32> to vector<24x1xf32>
      %42 = arith.addf %40, %41 : vector<24x1xf32>
      %43 = arith.negf %42 : vector<24x1xf32>
      %44 = math.exp %43 : vector<24x1xf32>
      %cst_46 = arith.constant 1.000000e+00 : f32
      %45 = vector.broadcast %cst_46 : f32 to vector<24x1xf32>
      %46 = arith.addf %45, %44 : vector<24x1xf32>
      %47 = arith.divf %45, %46 : vector<24x1xf32>
      %c0_47 = arith.constant 0 : index
      %c0_48 = arith.constant 0 : index
      %c0_49 = arith.constant 0 : index
      %48 = vector.load %arg5[%c0_47, %c0_48, %c0_49] : memref<2x24x1xf32, #tpu.memory_space<vmem>>, vector<1x24x1xf32>
      %49 = vector.shape_cast %48 : vector<1x24x1xf32> to vector<24x1xf32>
      %50 = vector.shape_cast %47 : vector<24x1xf32> to vector<1x24x1xf32>
      tpu.vector_store %arg5[%c0_47, %c0_48, %c0_49], %50 {strides = array<i32>} : memref<2x24x1xf32, #tpu.memory_space<vmem>>, vector<1x24x1xf32>,
      %51 = vector.extract_strided_slice %39 {offsets = [0, 1], sizes = [24, 1], strides = [1, 1]} : vector<24x4xf32> to vector<24x1xf32>
      %52 = vector.extract_strided_slice %39 {offsets = [0, 3], sizes = [24, 1], strides = [1, 1]} : vector<24x4xf32> to vector<24x1xf32>
      %53 = arith.addf %51, %52 : vector<24x1xf32>
      %54 = arith.negf %53 : vector<24x1xf32>
      %55 = math.exp %54 : vector<24x1xf32>
      %cst_50 = arith.constant 1.000000e+00 : f32
      %56 = vector.broadcast %cst_50 : f32 to vector<24x1xf32>
      %57 = arith.addf %56, %55 : vector<24x1xf32>
      %58 = arith.divf %56, %57 : vector<24x1xf32>
      %c1_51 = arith.constant 1 : index
      %c0_52 = arith.constant 0 : index
      %c0_53 = arith.constant 0 : index
      %59 = vector.load %arg5[%c1_51, %c0_52, %c0_53] : memref<2x24x1xf32, #tpu.memory_space<vmem>>, vector<1x24x1xf32>
      %60 = vector.shape_cast %59 : vector<1x24x1xf32> to vector<24x1xf32>
      %61 = vector.shape_cast %58 : vector<24x1xf32> to vector<1x24x1xf32>
      tpu.vector_store %arg5[%c1_51, %c0_52, %c0_53], %61 {strides = array<i32>} : memref<2x24x1xf32, #tpu.memory_space<vmem>>, vector<1x24x1xf32>,
    } else {
    }
    return
  }
  func.func @transform_0(%arg0: i32, %arg1: i32) -> (i32, i32, i32) {
    %c0_i32 = arith.constant 0 : i32
    %c0_i32_0 = arith.constant 0 : i32
    return %arg0, %c0_i32, %arg1 : i32, i32, i32
  }
  func.func @transform_1(%arg0: i32, %arg1: i32) -> (i32, i32) {
    %c0_i32 = arith.constant 0 : i32
    %c0_i32_0 = arith.constant 0 : i32
    %c0_i32_1 = arith.constant 0 : i32
    return %c0_i32, %c0_i32_0 : i32, i32
  }
  func.func @transform_2(%arg0: i32, %arg1: i32) -> (i32, i32) {
    %c0_i32 = arith.constant 0 : i32
    %c0_i32_0 = arith.constant 0 : i32
    %c0_i32_1 = arith.constant 0 : i32
    return %c0_i32, %c0_i32_0 : i32, i32
  }
  func.func @transform_3(%arg0: i32, %arg1: i32) -> (i32, i32, i32) {
    %c0_i32 = arith.constant 0 : i32
    %c0_i32_0 = arith.constant 0 : i32
    %c0_i32_1 = arith.constant 0 : i32
    return %arg0, %c0_i32, %c0_i32_0 : i32, i32, i32
  }
}

</mosaic_0001>

<bundles_post_ra>
// kernel: tpu_custom_call.1
= control target key start
LH: loop header
LB: loop body
LE: loop exit
PB: predicated region body
PF: predicated region fallthrough
CT: control target
= control target key end

     0   :  { %8 = vsyncpa [#allocation6], 0  ;;  %s527_s12 = smov [#allocation5]   ;;  %s656_s0 = inlined_call_operand.hbm [shape: f32[2,24,256], index: 0, kind: input, shape index: {}]   ;;  %s657_s1 = inlined_call_operand.vmem [shape: f32[2,24], index: 1, kind: input, shape index: {}]   ;;  %s658_s2 = inlined_call_operand.vmem [shape: f32[24,2], index: 2, kind: input, shape index: {}]   ;;  %s659_s3 = inlined_call_operand.vmem [shape: f32[2,24,1], index: 3, kind: output, shape index: {}]  }
   0x1   :  { %s14_s13 = sshll.u32 %s527_s12, 4  ;;  %s503_s16 = scalar_lea.hbm %s656_s0, 1536  ;;  %s15_s13 = int_to_ptr.vmem [resolvable:$true] %s14_s13 }
   0x2   :  { %p504_p0 = scmp.ne.s32.totalorder %s656_s0, %s503_s16  ;;  %p507_p1 = scmp.lt.u32.totalorder %s503_s16, %s656_s0 }
   0x4   :  { %p509_p2 = pnand %p507_p1, %p504_p0 }
   0x6   :  { %512 = shalt.err (!%p509_p2)
}
   0x7   :  { %s513_s21 = scalar_lea.vmem %s15_s13, 1536  ;;  %p518_p4 = scmp.lt.s32.totalorder %s15_s13, %s15_s13 }
   0x8   :  { %p514_p3 = scmp.ne.s32.totalorder %s15_s13, %s513_s21  ;;  %p519_p5 = scmp.lt.s32.totalorder %s513_s21, %s513_s21 }
   0xa   :  { %p520_p6 = por %p519_p5, %p518_p4 }
   0xc   :  { %p521_p7 = pnand %p520_p6, %p514_p3 }
   0xe   :  { %524 = shalt.err (!%p521_p7)
}
   0xf   :  { %s528_s22 = smov 256   ;;  %s529_s23 = smov 16  }
  0x10   :  { %20 = dma.hbm_to_vmem [thread:$0]  %s656_s0, 1536, %s15_s13, [#allocation6], %s528_s22, %s528_s22, %s529_s23  }
  0x11   :  { %525 = dma.done.wait [#allocation6], 1536  }
  0x12   :  { %526 = vsyncadd [#allocation6], 4294965760  ;;  %vm32_vm0 = vcmask 7168   ;;  %v530_v0 = vmov -inf   ;;  %v45_v1 = vld [vmem:[#allocation5] sm:$0xff]  ;;  %v46_v2 = vld [vmem:[#allocation5 + $0x8] sm:$0xff] }
  0x13   :  { %39 = vst.msk [vmem:[#allocation3] sm:$0xff] %vm32_vm0, %v530_v0  ;;  %40 = vst.msk [vmem:[#allocation3 + $0x8] sm:$0xff] %vm32_vm0, %v530_v0  ;;  %v47_v3 = vld [vmem:[#allocation5 + $0x10] sm:$0xff]  ;;  %v100_v4 = vmax.f32 %v45_v1, %v46_v2  ;;  %v48_v5 = vld [vmem:[#allocation5 + $0x18] sm:$0xff]  ;;  %v63_v21 = vadd.f32 %v46_v2, %v45_v1  ;;  %v531_v22 = vmov 0.0   ;;  %s532_s0 = smov 2  }
  0x14   :  { %41 = vst.msk [vmem:[#allocation3 + $0x10] sm:$0xff] %vm32_vm0, %v530_v0  ;;  %42 = vst.msk [vmem:[#allocation3 + $0x18] sm:$0xff] %vm32_vm0, %v530_v0  ;;  %v51_v6 = vld [vmem:[#allocation5 + $0x30] sm:$0xff]  ;;  %v52_v7 = vld [vmem:[#allocation5 + $0x38] sm:$0xff]  ;;  %v103_v11 = vmax.f32 %v47_v3, %v48_v5  ;;  %465 = vmatprep.subr.mxu1 %v531_v22  ;;  %v66_v25 = vadd.f32 %v48_v5, %v47_v3  ;;  %s533_s26 = smov 1   ;;  %s534_s27 = smov 3  }
  0x15   :  { %43 = vst.msk [vmem:[#allocation3 + $0x20] sm:$0xff] %vm32_vm0, %v530_v0  ;;  %44 = vst.msk [vmem:[#allocation3 + $0x28] sm:$0xff] %vm32_vm0, %v530_v0  ;;  %v72_v8 = vadd.f32 %v52_v7, %v51_v6  ;;  %v53_v9 = vld [vmem:[#allocation5 + $0x40] sm:$0xff]  ;;  %v54_v10 = vld [vmem:[#allocation5 + $0x48] sm:$0xff]  ;;  %101 = vmax.xlane.f32.xlu1 %v100_v4  ;;  %v109_v14 = vmax.f32 %v51_v6, %v52_v7  ;;  %v535_v2 = vmov 0.0|0.0   ;;  %vm536_vm1 = vmmov 0  }
  0x16   :  { %v75_v12 = vadd.f32 %v54_v10, %v53_v9  ;;  %v112_v13 = vmax.f32 %v53_v9, %v54_v10  ;;  %v49_v15 = vld [vmem:[#allocation5 + $0x20] sm:$0xff]  ;;  %v50_v16 = vld [vmem:[#allocation5 + $0x28] sm:$0xff]  ;;  %v55_v17 = vld [vmem:[#allocation5 + $0x50] sm:$0xff]  ;;  %36 = vst.msk [vmem:[#allocation2 + $0x18] sm:$0xff] %vm32_vm0, %v531_v22  ;;  %476 = vmatprep.subr.bf16.mxu0 %v535_v2  ;;  %462 = vmatprep.mubr.msk.f32.mxu0 %vm536_vm1, %v531_v22  ;;  %vm157_vm2 = vcmask 23568   ;;  %vm180_vm3 = vcmask 15368  }
  0x17   :  { %73 = vadd.xlane.f32.xlu0 %v72_v8  ;;  %v56_v18 = vld [vmem:[#allocation5 + $0x58] sm:$0xff]  ;;  %v106_v19 = vmax.f32 %v49_v15, %v50_v16  ;;  %33 = vst.msk [vmem:[#allocation2] sm:$0xff] %vm32_vm0, %v531_v22  ;;  %34 = vst.msk [vmem:[#allocation2 + $0x8] sm:$0xff] %vm32_vm0, %v531_v22  ;;  %v69_v24 = vadd.f32 %v50_v16, %v49_v15  ;;  %467 = vmatprep.mubr.msk.f32.mxu1 %vm536_vm1, %v531_v22  ;;  %vm200_vm4 = vcmask 31768   ;;  %vm211_vm5 = vcmask 195584   ;;  %s537_s8 = smov 126  }
  0x18   :  { %v78_v20 = vadd.f32 %v56_v18, %v55_v17  ;;  %35 = vst.msk [vmem:[#allocation2 + $0x10] sm:$0xff] %vm32_vm0, %v531_v22  ;;  %37 = vst.msk [vmem:[#allocation2 + $0x20] sm:$0xff] %vm32_vm0, %v531_v22  ;;  %v115_v23 = vmax.f32 %v55_v17, %v56_v18  ;;  %vm296_vm6 = vcmask 1041408   ;;  %vm286_vm7 = vcmask 15360   ;;  %s538_s10 = smov 127  }
  0x19   :  { %104 = vmax.xlane.f32.xlu1 %v103_v11  ;;  %38 = vst.msk [vmem:[#allocation2 + $0x28] sm:$0xff] %vm32_vm0, %v531_v22 }
  0x1a   :  { %v94_v26 = vld [vmem:[#allocation3] sm:$0xff]  ;;  %v95_v31 = vld [vmem:[#allocation3 + $0x8] sm:$0xff] }
  0x1b   :  { %76 = vadd.xlane.f32.xlu0 %v75_v12  ;;  %v97_v39 = vld [vmem:[#allocation3 + $0x18] sm:$0xff]  ;;  %v96_v45 = vld [vmem:[#allocation3 + $0x10] sm:$0xff] }
  0x1c   :  { %v98_v38 = vld [vmem:[#allocation3 + $0x20] sm:$0xff]  ;;  %v99_v55 = vld [vmem:[#allocation3 + $0x28] sm:$0xff] }
  0x1d   :  { %113 = vmax.xlane.f32.xlu1 %v112_v13  ;;  %v60_v27 = vld [vmem:[#allocation2 + $0x18] sm:$0xff] }
  0x1e   :  { %v57_v53 = vld [vmem:[#allocation2] sm:$0xff]  ;;  %v58_v0 = vld [vmem:[#allocation2 + $0x8] sm:$0xff] }
  0x1f   :  { %110 = vmax.xlane.f32.xlu0 %v109_v14  ;;  %v61_v33 = vld [vmem:[#allocation2 + $0x20] sm:$0xff]  ;;  %v59_v61 = vld [vmem:[#allocation2 + $0x10] sm:$0xff] }
  0x20   :  { %v62_v46 = vld [vmem:[#allocation2 + $0x28] sm:$0xff] }
  0x21   :  { %107 = vmax.xlane.f32.xlu1 %v106_v19 }
  0x23   :  { %79 = vadd.xlane.f32.xlu0 %v78_v20 }
  0x25   :  { %64 = vadd.xlane.f32.xlu1 %v63_v21 }
  0x27   :  { %116 = vmax.xlane.f32.xlu0 %v115_v23 }
  0x29   :  { %70 = vadd.xlane.f32.xlu1 %v69_v24 }
  0x2b   :  { %67 = vadd.xlane.f32.xlu0 %v66_v25 }
  0xa2   :  { %v102_v28 = vpop.xlane.xlu1 %101 }
  0xa3   :  { %v118_v29 = vmax.f32 %v94_v26, %v102_v28 }
  0xa4   :  { %v74_v30 = vpop.xlane.xlu0 %73 }
  0xa5   :  { %v84_v32 = vadd.f32 %v74_v30, %v60_v27  ;;  %124 = vst.msk [vmem:[#allocation3] sm:$0xff] %vm32_vm0, %v118_v29 }
  0xa6   :  { %v105_v34 = vpop.xlane.xlu1 %104 }
  0xa7   :  { %91 = vst.msk [vmem:[#allocation2 + $0x18] sm:$0xff] %vm32_vm0, %v84_v32  ;;  %v119_v35 = vmax.f32 %v95_v31, %v105_v34  ;;  %v204_v31 = vld [vmem:[%s657_s1] sm:$0x3] }
  0xa8   :  { %v77_v36 = vpop.xlane.xlu0 %76 }
  0xa9   :  { %v85_v37 = vadd.f32 %v77_v36, %v61_v33  ;;  %125 = vst.msk [vmem:[#allocation3 + $0x8] sm:$0xff] %vm32_vm0, %v119_v35  ;;  %v205_v35 = vld [vmem:[%s658_s2] sm:$0xff]  ;;  %v206_v36 = vld [vmem:[%s658_s2 + $0x8] sm:$0xff] }
  0xaa   :  { %v114_v40 = vpop.xlane.xlu1 %113 }
  0xab   :  { %92 = vst.msk [vmem:[#allocation2 + $0x20] sm:$0xff] %vm32_vm0, %v85_v37  ;;  %v122_v42 = vmax.f32 %v98_v38, %v114_v40  ;;  %v207_v37 = vld [vmem:[%s658_s2 + $0x10] sm:$0xff] }
  0xac   :  { %v111_v41 = vpop.xlane.xlu0 %110  ;;  %v142_v43 = vld [vmem:[#allocation3] sm:$0xff] }
  0xad   :  { %v121_v44 = vmax.f32 %v97_v39, %v111_v41  ;;  %148 = vrot.lane.b32.xlu0 %v142_v43, %s532_s0  ;;  %128 = vst.msk [vmem:[#allocation3 + $0x20] sm:$0xff] %vm32_vm0, %v122_v42 }
  0xae   :  { %v108_v47 = vpop.xlane.xlu1 %107  ;;  %v162_v48 = vld [vmem:[#allocation2 + $0x18] sm:$0xff] }
  0xaf   :  { %127 = vst.msk [vmem:[#allocation3 + $0x18] sm:$0xff] %vm32_vm0, %v121_v44  ;;  %v120_v50 = vmax.f32 %v96_v45, %v108_v47  ;;  %v165_v54 = vmul.f32 0.00390625, %v162_v48 }
  0xb0   :  { %v80_v49 = vpop.xlane.xlu0 %79  ;;  %v143_v51 = vld [vmem:[#allocation3 + $0x8] sm:$0xff] }
  0xb1   :  { %v86_v52 = vadd.f32 %v80_v49, %v62_v46  ;;  %150 = vrot.lane.b32.xlu1 %v143_v51, %s532_s0  ;;  %126 = vst.msk [vmem:[#allocation3 + $0x10] sm:$0xff] %vm32_vm0, %v120_v50 }
  0xb2   :  { %v163_v56 = vld [vmem:[#allocation2 + $0x20] sm:$0xff]  ;;  %v65_v57 = vpop.xlane.xlu1 %64 }
  0xb3   :  { %93 = vst.msk [vmem:[#allocation2 + $0x28] sm:$0xff] %vm32_vm0, %v86_v52  ;;  %v81_v59 = vadd.f32 %v65_v57, %v57_v53  ;;  %v166_v62 = vmul.f32 0.00390625, %v163_v56 }
  0xb4   :  { %v117_v58 = vpop.xlane.xlu0 %116  ;;  %v186_v8 = vld [vmem:[#allocation3 + $0x20] sm:$0xff] }
  0xb5   :  { %v123_v60 = vmax.f32 %v99_v55, %v117_v58  ;;  %171 = vrot.lane.b32.xlu1 %v165_v54, %s533_s26  ;;  %88 = vst.msk [vmem:[#allocation2] sm:$0xff] %vm32_vm0, %v81_v59 }
  0xb6   :  { %v185_v63 = vld [vmem:[#allocation3 + $0x18] sm:$0xff]  ;;  %v71_v1 = vpop.xlane.xlu1 %70 }
  0xb7   :  { %129 = vst.msk [vmem:[#allocation3 + $0x28] sm:$0xff] %vm32_vm0, %v123_v60  ;;  %191 = vrot.lane.b32.xlu0 %v185_v63, %s534_s27  ;;  %v83_v4 = vadd.f32 %v71_v1, %v59_v61 }
  0xb8   :  { %v68_v3 = vpop.xlane.xlu0 %67  ;;  %v144_v5 = vld [vmem:[#allocation3 + $0x10] sm:$0xff] }
  0xb9   :  { %v82_v6 = vadd.f32 %v68_v3, %v58_v0  ;;  %173 = vrot.lane.b32.xlu1 %v166_v62, %s533_s26  ;;  %90 = vst.msk [vmem:[#allocation2 + $0x10] sm:$0xff] %vm32_vm0, %v83_v4 }
  0xba   :  { %v164_v7 = vld [vmem:[#allocation2 + $0x28] sm:$0xff] }
  0xbb   :  { %152 = vrot.lane.b32.xlu0 %v144_v5, %s532_s0  ;;  %89 = vst.msk [vmem:[#allocation2 + $0x8] sm:$0xff] %vm32_vm0, %v82_v6  ;;  %v167_v10 = vmul.f32 0.00390625, %v164_v7 }
  0xbc   :  { %v133_v9 = vld [vmem:[#allocation2] sm:$0xff] }
  0xbd   :  { %193 = vrot.lane.b32.xlu1 %v186_v8, %s534_s27  ;;  %v136_v12 = vmul.f32 0.00390625, %v133_v9 }
  0xbe   :  { %v187_v11 = vld [vmem:[#allocation3 + $0x28] sm:$0xff] }
  0xbf   :  { %195 = vrot.lane.b32.xlu0 %v187_v11, %s534_s27  ;;  %139 = vst.msk [vmem:[#allocation4] sm:$0xff] %vm32_vm0, %v136_v12 }
  0xc0   :  { %v135_v13 = vld [vmem:[#allocation2 + $0x10] sm:$0xff] }
  0xc1   :  { %175 = vrot.lane.b32.xlu1 %v167_v10, %s533_s26  ;;  %v138_v15 = vmul.f32 0.00390625, %v135_v13 }
  0xc2   :  { %v134_v14 = vld [vmem:[#allocation2 + $0x8] sm:$0xff] }
  0xc3   :  { %v137_v16 = vmul.f32 0.00390625, %v134_v14  ;;  %141 = vst.msk [vmem:[#allocation4 + $0x10] sm:$0xff] %vm32_vm0, %v138_v15 }
  0xc5   :  { %140 = vst.msk [vmem:[#allocation4 + $0x8] sm:$0xff] %vm32_vm0, %v137_v16 }
 0x11f   :  { %v149_v17 = vpop.permute.xlu0 %148 }
 0x120   :  { %158 = vst.msk [vmem:[#allocation4] sm:$0xff] %vm157_vm2, %v149_v17 }
 0x123   :  { %v151_v18 = vpop.permute.xlu1 %150 }
 0x124   :  { %159 = vst.msk [vmem:[#allocation4 + $0x8] sm:$0xff] %vm157_vm2, %v151_v18 }
 0x127   :  { %v172_v19 = vpop.permute.xlu1 %171 }
 0x128   :  { %181 = vst.msk [vmem:[#allocation4] sm:$0xff] %vm180_vm3, %v172_v19 }
 0x129   :  { %v192_v20 = vpop.permute.xlu0 %191 }
 0x12a   :  { %201 = vst.msk [vmem:[#allocation4] sm:$0xff] %vm200_vm4, %v192_v20 }
 0x12b   :  { %v174_v21 = vpop.permute.xlu1 %173 }
 0x12c   :  { %182 = vst.msk [vmem:[#allocation4 + $0x8] sm:$0xff] %vm180_vm3, %v174_v21 }
 0x12d   :  { %v153_v23 = vpop.permute.xlu0 %152 }
 0x12e   :  { %160 = vst.msk [vmem:[#allocation4 + $0x10] sm:$0xff] %vm157_vm2, %v153_v23 }
 0x12f   :  { %v194_v24 = vpop.permute.xlu1 %193 }
 0x130   :  { %202 = vst.msk [vmem:[#allocation4 + $0x8] sm:$0xff] %vm200_vm4, %v194_v24 }
 0x131   :  { %v196_v25 = vpop.permute.xlu0 %195  ;;  %v208_v27 = vld [vmem:[#allocation4] sm:$0xff] }
 0x133   :  { %v176_v26 = vpop.permute.xlu1 %175 }
 0x134   :  { %183 = vst.msk [vmem:[#allocation4 + $0x10] sm:$0xff] %vm180_vm3, %v176_v26 }
 0x135   :  { %203 = vst.msk [vmem:[#allocation4 + $0x10] sm:$0xff] %vm200_vm4, %v196_v25 }
 0x137   :  { %v209_v28 = vld [vmem:[#allocation4 + $0x8] sm:$0xff] }
 0x138   :  { %v477_v29 = vpack.c.bf16 %v209_v28, %v208_v27 }
 0x13a   :  { %478 = vmatpush3.bf16.msra.mxu0 %v477_v29 }
 0x13b   :  { %460 = vmatprep.subr.mxu0 %v531_v22 }
 0x13c   :  { %v210_v30 = vld [vmem:[#allocation4 + $0x10] sm:$0xff] }
 0x13e   :  { %461 = vmatpush3.msra.mxu0 %v210_v30 }
 0x13f   :  { %463 = vmatmul.mubr.msk.f32.vlgmr.msra.gmra.mrb[0].mxu0 %vm211_vm5, %v204_v31 }
 0x212   :  { %v281_v32 = vpop.f32.mrb[0].mxu0 }
 0x213   :  { %v285_v33 = vmax.f32 %v281_v32, 0.0  ;;  %v464_v34 = vpop.f32.mrb[1].mxu0 }
 0x215   :  { %466 = vmatpush3.msk.msra.mxu1 %vm296_vm6, %v285_v33 }
 0x216   :  { %468 = vmatmul.mubr.msk.f32.vlgmr.msra.gmra.mrb[0].mxu1 %vm286_vm7, %v205_v35 }
 0x217   :  { %470 = vmatprep.mubr.msk.f32.mxu1 %vm536_vm1, %v531_v22 }
 0x21a   :  { %471 = vmatmul.mubr.msk.f32.gmra.mrb[2].mxu1 %vm286_vm7, %v206_v36 }
 0x21b   :  { %473 = vmatprep.mubr.msk.f32.mxu1 %vm536_vm1, %v531_v22 }
 0x21e   :  { %474 = vmatmul.mubr.msk.f32.gmra.mrb[4].mxu1 %vm286_vm7, %v207_v37 }
 0x2e9   :  { %v366_v38 = vpop.f32.mrb[0].mxu1 }
 0x2ea   :  { %383 = vrot.lane.b32.xlu1 %v366_v38, %s537_s8  ;;  %v469_v39 = vpop.f32.mrb[1].mxu1 }
 0x2ed   :  { %v371_v40 = vpop.f32.mrb[2].mxu1 }
 0x2ee   :  { %385 = vrot.lane.b32.xlu0 %v371_v40, %s537_s8  ;;  %v472_v41 = vpop.f32.mrb[3].mxu1 }
 0x2f1   :  { %v376_v42 = vpop.f32.mrb[4].mxu1 }
 0x2f2   :  { %387 = vrot.lane.b32.xlu1 %v376_v42, %s537_s8  ;;  %v475_v43 = vpop.f32.mrb[5].mxu1 }
 0x35c   :  { %v384_v44 = vpop.permute.xlu1 %383 }
 0x35d   :  { %v392_v45 = vadd.f32 %v384_v44, %v366_v38 }
 0x35f   :  { %v442_v46 = vmul.f32 -1.442695, %v392_v45 }
 0x360   :  { %v386_v47 = vpop.permute.xlu0 %385 }
 0x361   :  { %491 = vpow2.f32 %v442_v46  ;;  %v393_v22 = vadd.f32 %v386_v47, %v371_v40 }
 0x363   :  { %v443_v48 = vmul.f32 -1.442695, %v393_v22 }
 0x364   :  { %v388_v49 = vpop.permute.xlu1 %387 }
 0x365   :  { %493 = vpow2.f32 %v443_v48  ;;  %v394_v50 = vadd.f32 %v388_v49, %v376_v42 }
 0x367   :  { %v444_v51 = vmul.f32 -1.442695, %v394_v50 }
 0x369   :  { %495 = vpow2.f32 %v444_v51 }
 0x36b   :  { %v492_v52 = vpop.eup %491 }
 0x36c   :  { %v404_v53 = vadd.f32 1.0, %v492_v52 }
 0x36e   :  { %497 = vrcp.f32 %v404_v53 }
 0x36f   :  { %v494_v54 = vpop.eup %493 }
 0x370   :  { %v405_v55 = vadd.f32 1.0, %v494_v54 }
 0x372   :  { %499 = vrcp.f32 %v405_v55 }
 0x373   :  { %v496_v56 = vpop.eup %495 }
 0x374   :  { %v406_v57 = vadd.f32 1.0, %v496_v56 }
 0x376   :  { %501 = vrcp.f32 %v406_v57 }
 0x378   :  { %v498_v58 = vpop.eup %497 }
 0x379   :  { %413 = vst.msk [vmem:[%s659_s3] sm:$0xff] %vm32_vm0, %v498_v58  ;;  %419 = vrot.lane.b32.xlu0 %v498_v58, %s538_s10 }
 0x37c   :  { %v500_v59 = vpop.eup %499 }
 0x37d   :  { %414 = vst.msk [vmem:[%s659_s3 + $0x8] sm:$0xff] %vm32_vm0, %v500_v59  ;;  %421 = vrot.lane.b32.xlu1 %v500_v59, %s538_s10 }
 0x380   :  { %v502_v60 = vpop.eup %501 }
 0x381   :  { %415 = vst.msk [vmem:[%s659_s3 + $0x10] sm:$0xff] %vm32_vm0, %v502_v60  ;;  %423 = vrot.lane.b32.xlu0 %v502_v60, %s538_s10 }
 0x3eb   :  { %v420_v61 = vpop.permute.xlu0 %419 }
 0x3ec   :  { %445 = vst.msk [vmem:[%s659_s3 + $0x18] sm:$0xff] %vm32_vm0, %v420_v61 }
 0x3ef   :  { %v422_v62 = vpop.permute.xlu1 %421 }
 0x3f0   :  { %446 = vst.msk [vmem:[%s659_s3 + $0x20] sm:$0xff] %vm32_vm0, %v422_v62 }
 0x3f3   :  { %v424_v63 = vpop.permute.xlu0 %423 }
 0x3f4   :  { %447 = vst.msk [vmem:[%s659_s3 + $0x28] sm:$0xff] %vm32_vm0, %v424_v63 }
 0x3f5   :  { %436 = vsyncpa [#allocation6], 1 }

</bundles_post_ra>
